<compile_context>
chip_gen: v6e
topology: v6e:2x2x1
jax: 0.10.0
libtpu: 0.0.40
codegen_flags: <defaults>
</compile_context>

<pallas_src>
import random
from functools import partial

import jax
import jax.numpy as jnp
from jax.experimental import pallas as pl
from jax.experimental.pallas import tpu as pltpu

LANES = 128   # vreg lane width == per-gate padded width == padded vocab width
B_PAD = 8     # sublane-dense batch


# ----------------------------------------------------------------------------
# Fused Pallas kernel (encoder phase + decoder phase on one grid)
# ----------------------------------------------------------------------------
def _make_seq2seq_kernel(src_len, total_steps):
    HP = LANES  # per-gate padded column width

    def kernel(tf_ref,                                    # scalar prefetch (SMEM)
               enc_embs_ref, y_emb_ref,                   # [S,B,128], [T,B,128]
               w_enc_ref, b_enc_ref, w_dec_ref, b_dec_ref,
               dec_emb_ref, fc_w_ref, fc_b_ref,           # VMEM-resident tables
               out_ref,                                   # [B,128] logits block
               h_s, c_s, x_s):                            # VMEM scratch state
        g = pl.program_id(0)

        @pl.when(g == 0)
        def _():
            h_s[...] = jnp.zeros_like(h_s)
            c_s[...] = jnp.zeros_like(c_s)

        def lstm_step(x_emb, w_ref, b_ref):
            # x_emb has values in lanes [H, H+E); h_s in lanes [0, H); padded
            # lanes of both are exactly zero, so one add packs x|h into K=128.
            xh = x_emb + h_s[...]
            gates = (jnp.dot(xh, w_ref[...],
                             preferred_element_type=jnp.float32) + b_ref[...])
            i = jax.nn.sigmoid(gates[:, 0 * HP:1 * HP])
            f = jax.nn.sigmoid(gates[:, 1 * HP:2 * HP])
            gg = jnp.tanh(gates[:, 2 * HP:3 * HP])
            o = jax.nn.sigmoid(gates[:, 3 * HP:4 * HP])
            c_new = f * c_s[...] + i * gg
            h_new = o * jnp.tanh(c_new)
            c_s[...] = c_new
            h_s[...] = h_new
            return h_new

        # ------------------------- encoder phase -------------------------
        @pl.when(g < src_len)
        def _():
            out_ref[...] = jnp.zeros_like(out_ref)        # keeps outputs[0]==0
            lstm_step(enc_embs_ref[g], w_enc_ref, b_enc_ref)

        # ------------------------- decoder phase -------------------------
        @pl.when(g >= src_len)
        def _():
            @pl.when(g == src_len)
            def _():
                x_s[...] = y_emb_ref[0]                   # inp = y[0]

            h_new = lstm_step(x_s[...], w_dec_ref, b_dec_ref)
            logits = (jnp.dot(h_new, fc_w_ref[...],
                              preferred_element_type=jnp.float32)
                      + fc_b_ref[...])
            out_ref[...] = logits

            # Next-input selection; dead on the final grid step, so skip it.
            @pl.when(g < total_steps - 1)
            def _():
                t = g - (src_len - 1)                     # decode iteration idx
                tf = tf_ref[t]

                @pl.when(tf != 0)                         # teacher forcing
                def _():
                    x_s[...] = y_emb_ref[t]

                @pl.when(tf == 0)                         # feed back own argmax
                def _():
                    bsz, vp = logits.shape
                    iota_v = jax.lax.broadcasted_iota(jnp.int32, (bsz, vp), 1)
                    mx = jnp.max(logits, axis=-1, keepdims=True)
                    top1 = jnp.min(jnp.where(logits == mx, iota_v, vp),
                                   axis=-1, keepdims=True)
                    onehot = (iota_v == top1).astype(jnp.float32)
                    x_s[...] = jnp.dot(onehot, dec_emb_ref[...],
                                       preferred_element_type=jnp.float32)

    return kernel


# ----------------------------------------------------------------------------
# pallas_call wrapper (jitted)
# ----------------------------------------------------------------------------
@partial(jax.jit, static_argnums=(4, 5))
def seq2seq_forward(padded, x_tokens, y_tokens, tf_mask, trg_vocab, b_pad):
    s_len, bsz = x_tokens.shape
    t_len = y_tokens.shape[0]
    lanes = padded["enc_emb_p"].shape[1]
    v_pad = padded["fc_w_p"].shape[1]
    total = s_len + t_len - 1

    # Pad batch to 8 sublanes with token-0 rows (independent, discarded later).
    xb = jnp.zeros((s_len, b_pad), x_tokens.dtype).at[:, :bsz].set(x_tokens)
    yb = jnp.zeros((t_len, b_pad), y_tokens.dtype).at[:, :bsz].set(y_tokens)

    enc_embs = jnp.take(padded["enc_emb_p"], xb, axis=0)       # [S, 8, 128]
    y_emb = jnp.take(padded["dec_emb_p"], yb, axis=0)          # [T, 8, 128]

    out = pl.pallas_call(
        _make_seq2seq_kernel(s_len, total),
        out_shape=jax.ShapeDtypeStruct((total, b_pad, v_pad), jnp.float32),
        grid_spec=pltpu.PrefetchScalarGridSpec(
            num_scalar_prefetch=1,                # tf_mask -> SMEM
            grid=(total,),
            in_specs=[
                pl.BlockSpec(enc_embs.shape, lambda g, tf: (0, 0, 0)),
                pl.BlockSpec(y_emb.shape, lambda g, tf: (0, 0, 0)),
                pl.BlockSpec(padded["enc_w_cat"].shape, lambda g, tf: (0, 0)),
                pl.BlockSpec(padded["enc_b_p"].shape, lambda g, tf: (0, 0)),
                pl.BlockSpec(padded["dec_w_cat"].shape, lambda g, tf: (0, 0)),
                pl.BlockSpec(padded["dec_b_p"].shape, lambda g, tf: (0, 0)),
                pl.BlockSpec(padded["dec_emb_p"].shape, lambda g, tf: (0, 0)),
                pl.BlockSpec(padded["fc_w_p"].shape, lambda g, tf: (0, 0)),
                pl.BlockSpec(padded["fc_b_p"].shape, lambda g, tf: (0, 0)),
            ],
            out_specs=pl.BlockSpec((None, b_pad, v_pad), lambda g, tf: (g, 0, 0)),
            scratch_shapes=[
                pltpu.VMEM((b_pad, lanes), jnp.float32),   # h  (lanes [0,H))
                pltpu.VMEM((b_pad, lanes), jnp.float32),   # c  (lanes [0,H))
                pltpu.VMEM((b_pad, lanes), jnp.float32),   # current input emb
            ],
        ),
        compiler_params=pltpu.CompilerParams(
            dimension_semantics=("arbitrary",)),
    )(tf_mask, enc_embs, y_emb,
      padded["enc_w_cat"], padded["enc_b_p"],
      padded["dec_w_cat"], padded["dec_b_p"],
      padded["dec_emb_p"], padded["fc_w_p"], padded["fc_b_p"])

    # Rows [S-1, S+T-1): row S-1 is a zero block (outputs[0]), then the logits
    # for decode steps t = 1 .. T-1.  Un-pad batch and vocab.
    return out[s_len - 1:, :bsz, :trg_vocab]


# ----------------------------------------------------------------------------
# Parameters (deterministic synthetic init) + lane-layout padding
# ----------------------------------------------------------------------------
def init_params(key, src_vocab, trg_vocab, emb_dim, hid_dim):
    ks = jax.random.split(key, 10)
    u = lambda k, shape, s=0.1: jax.random.uniform(k, shape, jnp.float32, -s, s)
    return {
        "enc_emb": u(ks[0], (src_vocab, emb_dim)),
        "enc_wih_t": u(ks[1], (emb_dim, 4 * hid_dim)),   # W_ih^T
        "enc_whh_t": u(ks[2], (hid_dim, 4 * hid_dim)),   # W_hh^T
        "enc_b": u(ks[3], (1, 4 * hid_dim)),             # b_ih + b_hh folded
        "dec_emb": u(ks[4], (trg_vocab, emb_dim)),
        "dec_wih_t": u(ks[5], (emb_dim, 4 * hid_dim)),
        "dec_whh_t": u(ks[6], (hid_dim, 4 * hid_dim)),
        "dec_b": u(ks[7], (1, 4 * hid_dim)),
        "fc_w_t": u(ks[8], (hid_dim, trg_vocab)),        # fc_out.weight^T
        "fc_b": u(ks[9], (1, trg_vocab)),
    }


def pad_params(base, emb_dim, hid_dim, trg_vocab, lanes=LANES, v_pad=LANES):
    """Lane layout: h -> lanes [0,H); x (embedding) -> lanes [H,H+E).

    Gate columns padded to `lanes` each (zero weights / zero bias keep the
    padded lanes of h and c at exactly zero).  fc_out bias pad lanes = -1e30
    so the in-kernel greedy argmax never selects a padded vocab index.
    """
    H, E = hid_dim, emb_dim
    HP = lanes
    X_OFF = H                                  # embedding lanes start after h

    def pad_gate_cols(w):                      # [K, 4H] -> [K, 4*HP]
        k = w.shape[0]
        out = jnp.zeros((k, 4 * HP), jnp.float32)
        for g in range(4):
            out = out.at[:, g * HP:g * HP + H].set(w[:, g * H:(g + 1) * H])
        return out

    def cat_weight(wih_t, whh_t):              # -> [lanes, 4*HP]
        w = jnp.zeros((lanes, 4 * HP), jnp.float32)
        w = w.at[0:H, :].set(pad_gate_cols(whh_t))            # h rows
        w = w.at[X_OFF:X_OFF + E, :].set(pad_gate_cols(wih_t))  # x rows
        return w

    def pad_emb(emb, rows):                    # [V, E] -> [rows, lanes]
        v = emb.shape[0]
        return jnp.zeros((rows, lanes), jnp.float32).at[
            :v, X_OFF:X_OFF + E].set(emb)

    fc_w_p = jnp.zeros((lanes, v_pad), jnp.float32).at[
        :H, :trg_vocab].set(base["fc_w_t"])                    # h rows 0:H
    fc_b_p = jnp.full((1, v_pad), -1e30, jnp.float32).at[
        :, :trg_vocab].set(base["fc_b"])

    return {
        "enc_emb_p": pad_emb(base["enc_emb"], base["enc_emb"].shape[0]),
        "enc_w_cat": cat_weight(base["enc_wih_t"], base["enc_whh_t"]),
        "enc_b_p": pad_gate_cols(base["enc_b"]),
        "dec_emb_p": pad_emb(base["dec_emb"], v_pad),   # rows padded for one-hot
        "dec_w_cat": cat_weight(base["dec_wih_t"], base["dec_whh_t"]),
        "dec_b_p": pad_gate_cols(base["dec_b"]),
        "fc_w_p": fc_w_p,
        "fc_b_p": fc_b_p,
    }


# ----------------------------------------------------------------------------
# Pure-JAX reference (unpadded) for verification
# ----------------------------------------------------------------------------
def reference_forward(base, x_tokens, y_tokens, tf_mask, hid_dim):
    hp = jax.lax.Precision.HIGHEST

    def cell(x, h, c, wih_t, whh_t, b):
        g = (jnp.dot(x, wih_t, precision=hp)
             + jnp.dot(h, whh_t, precision=hp) + b)
        H = h.shape[-1]
        i = jax.nn.sigmoid(g[:, :H])
        f = jax.nn.sigmoid(g[:, H:2 * H])
        gg = jnp.tanh(g[:, 2 * H:3 * H])
        o = jax.nn.sigmoid(g[:, 3 * H:])
        c2 = f * c + i * gg
        return o * jnp.tanh(c2), c2

    s_len, bsz = x_tokens.shape
    t_len = y_tokens.shape[0]
    vocab = base["fc_w_t"].shape[1]

    h = jnp.zeros((bsz, hid_dim), jnp.float32)
    c = jnp.zeros((bsz, hid_dim), jnp.float32)
    for t in range(s_len):
        emb = base["enc_emb"][x_tokens[t]]
        h, c = cell(emb, h, c, base["enc_wih_t"], base["enc_whh_t"], base["enc_b"])

    outputs = [jnp.zeros((bsz, vocab), jnp.float32)]
    inp = y_tokens[0]
    for t in range(1, t_len):
        emb = base["dec_emb"][inp]
        h, c = cell(emb, h, c, base["dec_wih_t"], base["dec_whh_t"], base["dec_b"])
        logits = jnp.dot(h, base["fc_w_t"], precision=hp) + base["fc_b"]
        outputs.append(logits)
        top1 = jnp.argmax(logits, axis=1).astype(y_tokens.dtype)
        inp = jnp.where(tf_mask[t] != 0, y_tokens[t], top1)
    return jnp.stack(outputs, axis=0)


# ----------------------------------------------------------------------------
if __name__ == "__main__":
    random.seed(0)

    SRC_VOCAB = 48
    TRG_VOCAB = 32
    EMB_DIM = 16
    HID_DIM = 32
    SRC_LEN = 6
    TRG_LEN = 5
    BATCH = 4
    TEACHER_FORCING_RATIO = 0.5

    assert HID_DIM + EMB_DIM <= LANES and TRG_VOCAB <= LANES

    key = jax.random.PRNGKey(0)
    kp, kx, ky = jax.random.split(key, 3)

    base = init_params(kp, SRC_VOCAB, TRG_VOCAB, EMB_DIM, HID_DIM)
    padded = pad_params(base, EMB_DIM, HID_DIM, TRG_VOCAB)

    x_tokens = jax.random.randint(kx, (SRC_LEN, BATCH), 0, SRC_VOCAB, jnp.int32)
    y_tokens = jax.random.randint(ky, (TRG_LEN, BATCH), 0, TRG_VOCAB, jnp.int32)

    # Host RNG teacher-forcing decisions drawn once (like the PyTorch loop),
    # then passed to the fused kernel as data via scalar prefetch. Index 0 unused.
    tf_list = [0] + [int(random.random() < TEACHER_FORCING_RATIO)
                     for _ in range(TRG_LEN - 1)]
    tf_mask = jnp.array(tf_list, dtype=jnp.int32)

    outputs = seq2seq_forward(padded, x_tokens, y_tokens, tf_mask,
                              TRG_VOCAB, B_PAD)
    outputs = jax.block_until_ready(outputs)

    # Correctness check against a pure-JAX (unpadded) reference.
    ref = reference_forward(base, x_tokens, y_tokens, tf_mask, HID_DIM)
    max_err = float(jnp.max(jnp.abs(outputs - ref)))

    assert outputs.shape == (TRG_LEN, BATCH, TRG_VOCAB)
    assert outputs.dtype == jnp.float32
    assert bool(jnp.all(outputs[0] == 0.0))
    assert max_err < 5e-3, f"mismatch vs reference: {max_err}"
    print("KERNEL_OK")
</pallas_src>

<mosaic_0001>
module attributes {stable_mosaic.version = 11 : i64} {
  func.func @kernel(%arg0: i32, %arg1: memref<5xi32, #tpu.memory_space<smem>>, %arg2: memref<6x8x128xf32, #tpu.memory_space<vmem>>, %arg3: memref<5x8x128xf32, #tpu.memory_space<vmem>>, %arg4: memref<128x512xf32, #tpu.memory_space<vmem>>, %arg5: memref<1x512xf32, #tpu.memory_space<vmem>>, %arg6: memref<128x512xf32, #tpu.memory_space<vmem>>, %arg7: memref<1x512xf32, #tpu.memory_space<vmem>>, %arg8: memref<128x128xf32, #tpu.memory_space<vmem>>, %arg9: memref<128x128xf32, #tpu.memory_space<vmem>>, %arg10: memref<1x128xf32, #tpu.memory_space<vmem>>, %arg11: memref<1x8x128xf32, #tpu.memory_space<vmem>>, %arg12: memref<8x128xf32, #tpu.memory_space<vmem>>, %arg13: memref<8x128xf32, #tpu.memory_space<vmem>>, %arg14: memref<8x128xf32, #tpu.memory_space<vmem>>) attributes {dimension_semantics = [#tpu.dimension_semantics<arbitrary>], iteration_bounds = array<i64: 10>, scalar_prefetch = 1 : i64, scratch_operands = 3 : i64, tpu.core_type = #tpu.core_type<tc>, window_params = [{pipeline_mode = #tpu.pipeline_mode<synchronous>, transform_indices = @transform_0, window_bounds = array<i64: 6, 8, 128>}, {pipeline_mode = #tpu.pipeline_mode<synchronous>, transform_indices = @transform_1, window_bounds = array<i64: 5, 8, 128>}, {pipeline_mode = #tpu.pipeline_mode<synchronous>, transform_indices = @transform_2, window_bounds = array<i64: 128, 512>}, {pipeline_mode = #tpu.pipeline_mode<synchronous>, transform_indices = @transform_3, window_bounds = array<i64: 1, 512>}, {pipeline_mode = #tpu.pipeline_mode<synchronous>, transform_indices = @transform_4, window_bounds = array<i64: 128, 512>}, {pipeline_mode = #tpu.pipeline_mode<synchronous>, transform_indices = @transform_5, window_bounds = array<i64: 1, 512>}, {pipeline_mode = #tpu.pipeline_mode<synchronous>, transform_indices = @transform_6, window_bounds = array<i64: 128, 128>}, {pipeline_mode = #tpu.pipeline_mode<synchronous>, transform_indices = @transform_7, window_bounds = array<i64: 128, 128>}, {pipeline_mode = #tpu.pipeline_mode<synchronous>, transform_indices = @transform_8, window_bounds = array<i64: 1, 128>}, {transform_indices = @transform_9, window_bounds = array<i64: 1, 8, 128>}]} {
    %c0_i32 = arith.constant 0 : i32
    %0 = arith.cmpi eq, %arg0, %c0_i32 : i32
    %1 = arith.extui %0 : i1 to i32
    %c0_i32_0 = arith.constant 0 : i32
    %2 = arith.cmpi ne, %1, %c0_i32_0 : i32
    scf.if %2 {
      %cst = arith.constant 0.000000e+00 : f32
      %9 = vector.broadcast %cst : f32 to vector<8x128xf32>
      %c0 = arith.constant 0 : index
      %c0_4 = arith.constant 0 : index
      %10 = vector.load %arg12[%c0, %c0_4] : memref<8x128xf32, #tpu.memory_space<vmem>>, vector<8x128xf32>
      tpu.vector_store %arg12[%c0, %c0_4], %9 {strides = array<i32>} : memref<8x128xf32, #tpu.memory_space<vmem>>, vector<8x128xf32>,
      %cst_5 = arith.constant 0.000000e+00 : f32
      %11 = vector.broadcast %cst_5 : f32 to vector<8x128xf32>
      %c0_6 = arith.constant 0 : index
      %c0_7 = arith.constant 0 : index
      %12 = vector.load %arg13[%c0_6, %c0_7] : memref<8x128xf32, #tpu.memory_space<vmem>>, vector<8x128xf32>
      tpu.vector_store %arg13[%c0_6, %c0_7], %11 {strides = array<i32>} : memref<8x128xf32, #tpu.memory_space<vmem>>, vector<8x128xf32>,
    } else {
    }
    %c6_i32 = arith.constant 6 : i32
    %3 = arith.cmpi slt, %arg0, %c6_i32 : i32
    %4 = arith.extui %3 : i1 to i32
    %c0_i32_1 = arith.constant 0 : i32
    %5 = arith.cmpi ne, %4, %c0_i32_1 : i32
    scf.if %5 {
      %cst = arith.constant 0.000000e+00 : f32
      %9 = vector.broadcast %cst : f32 to vector<8x128xf32>
      %c0 = arith.constant 0 : index
      %c0_4 = arith.constant 0 : index
      %c0_5 = arith.constant 0 : index
      %10 = vector.load %arg11[%c0, %c0_4, %c0_5] : memref<1x8x128xf32, #tpu.memory_space<vmem>>, vector<1x8x128xf32>
      %11 = vector.shape_cast %10 : vector<1x8x128xf32> to vector<8x128xf32>
      %12 = vector.shape_cast %9 : vector<8x128xf32> to vector<1x8x128xf32>
      tpu.vector_store %arg11[%c0, %c0_4, %c0_5], %12 {strides = array<i32>} : memref<1x8x128xf32, #tpu.memory_space<vmem>>, vector<1x8x128xf32>,
      %13 = arith.index_cast %arg0 : i32 to index
      %c0_6 = arith.constant 0 : index
      %c0_7 = arith.constant 0 : index
      %14 = vector.load %arg2[%13, %c0_6, %c0_7] : memref<6x8x128xf32, #tpu.memory_space<vmem>>, vector<1x8x128xf32>
      %15 = vector.shape_cast %14 : vector<1x8x128xf32> to vector<8x128xf32>
      %c0_8 = arith.constant 0 : index
      %c0_9 = arith.constant 0 : index
      %16 = vector.load %arg12[%c0_8, %c0_9] : memref<8x128xf32, #tpu.memory_space<vmem>>, vector<8x128xf32>
      %17 = arith.addf %15, %16 : vector<8x128xf32>
      %c0_10 = arith.constant 0 : index
      %c0_11 = arith.constant 0 : index
      %18 = vector.load %arg4[%c0_10, %c0_11] : memref<128x512xf32, #tpu.memory_space<vmem>>, vector<128x512xf32>
      %cst_12 = arith.constant dense<0.000000e+00> : vector<8x512xf32>
      %19 = tpu.matmul %17, %18, %cst_12 {dimension_numbers = #tpu.dot_dimension_numbers<[1], [0], [0], [1], [0, 0, 1, 1], [], []>} : vector<8x128xf32>, vector<128x512xf32>, vector<8x512xf32> -> vector<8x512xf32>
      %c0_13 = arith.constant 0 : index
      %c0_14 = arith.constant 0 : index
      %20 = vector.load %arg5[%c0_13, %c0_14] : memref<1x512xf32, #tpu.memory_space<vmem>>, vector<1x512xf32>
      %21 = vector.broadcast %20 : vector<1x512xf32> to vector<8x512xf32>
      %22 = arith.addf %19, %21 : vector<8x512xf32>
      %23 = vector.extract_strided_slice %22 {offsets = [0, 0], sizes = [8, 128], strides = [1, 1]} : vector<8x512xf32> to vector<8x128xf32>
      %24 = arith.negf %23 : vector<8x128xf32>
      %25 = math.exp %24 : vector<8x128xf32>
      %cst_15 = arith.constant 1.000000e+00 : f32
      %26 = vector.broadcast %cst_15 : f32 to vector<8x128xf32>
      %27 = arith.addf %26, %25 : vector<8x128xf32>
      %28 = arith.divf %26, %27 : vector<8x128xf32>
      %29 = vector.extract_strided_slice %22 {offsets = [0, 128], sizes = [8, 128], strides = [1, 1]} : vector<8x512xf32> to vector<8x128xf32>
      %30 = arith.negf %29 : vector<8x128xf32>
      %31 = math.exp %30 : vector<8x128xf32>
      %cst_16 = arith.constant 1.000000e+00 : f32
      %32 = vector.broadcast %cst_16 : f32 to vector<8x128xf32>
      %33 = arith.addf %32, %31 : vector<8x128xf32>
      %34 = arith.divf %32, %33 : vector<8x128xf32>
      %35 = vector.extract_strided_slice %22 {offsets = [0, 256], sizes = [8, 128], strides = [1, 1]} : vector<8x512xf32> to vector<8x128xf32>
      %36 = math.tanh %35 : vector<8x128xf32>
      %37 = vector.extract_strided_slice %22 {offsets = [0, 384], sizes = [8, 128], strides = [1, 1]} : vector<8x512xf32> to vector<8x128xf32>
      %38 = arith.negf %37 : vector<8x128xf32>
      %39 = math.exp %38 : vector<8x128xf32>
      %cst_17 = arith.constant 1.000000e+00 : f32
      %40 = vector.broadcast %cst_17 : f32 to vector<8x128xf32>
      %41 = arith.addf %40, %39 : vector<8x128xf32>
      %42 = arith.divf %40, %41 : vector<8x128xf32>
      %c0_18 = arith.constant 0 : index
      %c0_19 = arith.constant 0 : index
      %43 = vector.load %arg13[%c0_18, %c0_19] : memref<8x128xf32, #tpu.memory_space<vmem>>, vector<8x128xf32>
      %44 = arith.mulf %34, %43 : vector<8x128xf32>
      %45 = arith.mulf %28, %36 : vector<8x128xf32>
      %46 = arith.addf %44, %45 : vector<8x128xf32>
      %47 = math.tanh %46 : vector<8x128xf32>
      %48 = arith.mulf %42, %47 : vector<8x128xf32>
      %c0_20 = arith.constant 0 : index
      %c0_21 = arith.constant 0 : index
      %49 = vector.load %arg13[%c0_20, %c0_21] : memref<8x128xf32, #tpu.memory_space<vmem>>, vector<8x128xf32>
      tpu.vector_store %arg13[%c0_20, %c0_21], %46 {strides = array<i32>} : memref<8x128xf32, #tpu.memory_space<vmem>>, vector<8x128xf32>,
      %c0_22 = arith.constant 0 : index
      %c0_23 = arith.constant 0 : index
      %50 = vector.load %arg12[%c0_22, %c0_23] : memref<8x128xf32, #tpu.memory_space<vmem>>, vector<8x128xf32>
      tpu.vector_store %arg12[%c0_22, %c0_23], %48 {strides = array<i32>} : memref<8x128xf32, #tpu.memory_space<vmem>>, vector<8x128xf32>,
    } else {
    }
    %c6_i32_2 = arith.constant 6 : i32
    %6 = arith.cmpi sge, %arg0, %c6_i32_2 : i32
    %7 = arith.extui %6 : i1 to i32
    %c0_i32_3 = arith.constant 0 : i32
    %8 = arith.cmpi ne, %7, %c0_i32_3 : i32
    scf.if %8 {
      %c6_i32_4 = arith.constant 6 : i32
      %9 = arith.cmpi eq, %arg0, %c6_i32_4 : i32
      %10 = arith.extui %9 : i1 to i32
      %c0_i32_5 = arith.constant 0 : i32
      %11 = arith.cmpi ne, %10, %c0_i32_5 : i32
      scf.if %11 {
        %c0_31 = arith.constant 0 : index
        %c0_32 = arith.constant 0 : index
        %c0_33 = arith.constant 0 : index
        %59 = vector.load %arg3[%c0_31, %c0_32, %c0_33] : memref<5x8x128xf32, #tpu.memory_space<vmem>>, vector<1x8x128xf32>
        %60 = vector.shape_cast %59 : vector<1x8x128xf32> to vector<8x128xf32>
        %c0_34 = arith.constant 0 : index
        %c0_35 = arith.constant 0 : index
        %61 = vector.load %arg14[%c0_34, %c0_35] : memref<8x128xf32, #tpu.memory_space<vmem>>, vector<8x128xf32>
        tpu.vector_store %arg14[%c0_34, %c0_35], %60 {strides = array<i32>} : memref<8x128xf32, #tpu.memory_space<vmem>>, vector<8x128xf32>,
      } else {
      }
      %c0 = arith.constant 0 : index
      %c0_6 = arith.constant 0 : index
      %12 = vector.load %arg14[%c0, %c0_6] : memref<8x128xf32, #tpu.memory_space<vmem>>, vector<8x128xf32>
      %c0_7 = arith.constant 0 : index
      %c0_8 = arith.constant 0 : index
      %13 = vector.load %arg12[%c0_7, %c0_8] : memref<8x128xf32, #tpu.memory_space<vmem>>, vector<8x128xf32>
      %14 = arith.addf %12, %13 : vector<8x128xf32>
      %c0_9 = arith.constant 0 : index
      %c0_10 = arith.constant 0 : index
      %15 = vector.load %arg6[%c0_9, %c0_10] : memref<128x512xf32, #tpu.memory_space<vmem>>, vector<128x512xf32>
      %cst = arith.constant dense<0.000000e+00> : vector<8x512xf32>
      %16 = tpu.matmul %14, %15, %cst {dimension_numbers = #tpu.dot_dimension_numbers<[1], [0], [0], [1], [0, 0, 1, 1], [], []>} : vector<8x128xf32>, vector<128x512xf32>, vector<8x512xf32> -> vector<8x512xf32>
      %c0_11 = arith.constant 0 : index
      %c0_12 = arith.constant 0 : index
      %17 = vector.load %arg7[%c0_11, %c0_12] : memref<1x512xf32, #tpu.memory_space<vmem>>, vector<1x512xf32>
      %18 = vector.broadcast %17 : vector<1x512xf32> to vector<8x512xf32>
      %19 = arith.addf %16, %18 : vector<8x512xf32>
      %20 = vector.extract_strided_slice %19 {offsets = [0, 0], sizes = [8, 128], strides = [1, 1]} : vector<8x512xf32> to vector<8x128xf32>
      %21 = arith.negf %20 : vector<8x128xf32>
      %22 = math.exp %21 : vector<8x128xf32>
      %cst_13 = arith.constant 1.000000e+00 : f32
      %23 = vector.broadcast %cst_13 : f32 to vector<8x128xf32>
      %24 = arith.addf %23, %22 : vector<8x128xf32>
      %25 = arith.divf %23, %24 : vector<8x128xf32>
      %26 = vector.extract_strided_slice %19 {offsets = [0, 128], sizes = [8, 128], strides = [1, 1]} : vector<8x512xf32> to vector<8x128xf32>
      %27 = arith.negf %26 : vector<8x128xf32>
      %28 = math.exp %27 : vector<8x128xf32>
      %cst_14 = arith.constant 1.000000e+00 : f32
      %29 = vector.broadcast %cst_14 : f32 to vector<8x128xf32>
      %30 = arith.addf %29, %28 : vector<8x128xf32>
      %31 = arith.divf %29, %30 : vector<8x128xf32>
      %32 = vector.extract_strided_slice %19 {offsets = [0, 256], sizes = [8, 128], strides = [1, 1]} : vector<8x512xf32> to vector<8x128xf32>
      %33 = math.tanh %32 : vector<8x128xf32>
      %34 = vector.extract_strided_slice %19 {offsets = [0, 384], sizes = [8, 128], strides = [1, 1]} : vector<8x512xf32> to vector<8x128xf32>
      %35 = arith.negf %34 : vector<8x128xf32>
      %36 = math.exp %35 : vector<8x128xf32>
      %cst_15 = arith.constant 1.000000e+00 : f32
      %37 = vector.broadcast %cst_15 : f32 to vector<8x128xf32>
      %38 = arith.addf %37, %36 : vector<8x128xf32>
      %39 = arith.divf %37, %38 : vector<8x128xf32>
      %c0_16 = arith.constant 0 : index
      %c0_17 = arith.constant 0 : index
      %40 = vector.load %arg13[%c0_16, %c0_17] : memref<8x128xf32, #tpu.memory_space<vmem>>, vector<8x128xf32>
      %41 = arith.mulf %31, %40 : vector<8x128xf32>
      %42 = arith.mulf %25, %33 : vector<8x128xf32>
      %43 = arith.addf %41, %42 : vector<8x128xf32>
      %44 = math.tanh %43 : vector<8x128xf32>
      %45 = arith.mulf %39, %44 : vector<8x128xf32>
      %c0_18 = arith.constant 0 : index
      %c0_19 = arith.constant 0 : index
      %46 = vector.load %arg13[%c0_18, %c0_19] : memref<8x128xf32, #tpu.memory_space<vmem>>, vector<8x128xf32>
      tpu.vector_store %arg13[%c0_18, %c0_19], %43 {strides = array<i32>} : memref<8x128xf32, #tpu.memory_space<vmem>>, vector<8x128xf32>,
      %c0_20 = arith.constant 0 : index
      %c0_21 = arith.constant 0 : index
      %47 = vector.load %arg12[%c0_20, %c0_21] : memref<8x128xf32, #tpu.memory_space<vmem>>, vector<8x128xf32>
      tpu.vector_store %arg12[%c0_20, %c0_21], %45 {strides = array<i32>} : memref<8x128xf32, #tpu.memory_space<vmem>>, vector<8x128xf32>,
      %c0_22 = arith.constant 0 : index
      %c0_23 = arith.constant 0 : index
      %48 = vector.load %arg9[%c0_22, %c0_23] : memref<128x128xf32, #tpu.memory_space<vmem>>, vector<128x128xf32>
      %cst_24 = arith.constant dense<0.000000e+00> : vector<8x128xf32>
      %49 = tpu.matmul %45, %48, %cst_24 {dimension_numbers = #tpu.dot_dimension_numbers<[1], [0], [0], [1], [0, 0, 1, 1], [], []>} : vector<8x128xf32>, vector<128x128xf32>, vector<8x128xf32> -> vector<8x128xf32>
      %c0_25 = arith.constant 0 : index
      %c0_26 = arith.constant 0 : index
      %50 = vector.load %arg10[%c0_25, %c0_26] : memref<1x128xf32, #tpu.memory_space<vmem>>, vector<1x128xf32>
      %51 = vector.broadcast %50 : vector<1x128xf32> to vector<8x128xf32>
      %52 = arith.addf %49, %51 : vector<8x128xf32>
      %c0_27 = arith.constant 0 : index
      %c0_28 = arith.constant 0 : index
      %c0_29 = arith.constant 0 : index
      %53 = vector.load %arg11[%c0_27, %c0_28, %c0_29] : memref<1x8x128xf32, #tpu.memory_space<vmem>>, vector<1x8x128xf32>
      %54 = vector.shape_cast %53 : vector<1x8x128xf32> to vector<8x128xf32>
      %55 = vector.shape_cast %52 : vector<8x128xf32> to vector<1x8x128xf32>
      tpu.vector_store %arg11[%c0_27, %c0_28, %c0_29], %55 {strides = array<i32>} : memref<1x8x128xf32, #tpu.memory_space<vmem>>, vector<1x8x128xf32>,
      %c9_i32 = arith.constant 9 : i32
      %56 = arith.cmpi slt, %arg0, %c9_i32 : i32
      %57 = arith.extui %56 : i1 to i32
      %c0_i32_30 = arith.constant 0 : i32
      %58 = arith.cmpi ne, %57, %c0_i32_30 : i32
      scf.if %58 {
        %c5_i32 = arith.constant 5 : i32
        %59 = arith.subi %arg0, %c5_i32 : i32
        %60 = arith.index_cast %59 : i32 to index
        %61 = memref.load %arg1[%60] : memref<5xi32, #tpu.memory_space<smem>>
        %c0_i32_31 = arith.constant 0 : i32
        %62 = arith.cmpi ne, %61, %c0_i32_31 : i32
        %63 = arith.extui %62 : i1 to i32
        %c0_i32_32 = arith.constant 0 : i32
        %64 = arith.cmpi ne, %63, %c0_i32_32 : i32
        scf.if %64 {
          %68 = arith.index_cast %59 : i32 to index
          %c0_35 = arith.constant 0 : index
          %c0_36 = arith.constant 0 : index
          %69 = vector.load %arg3[%68, %c0_35, %c0_36] : memref<5x8x128xf32, #tpu.memory_space<vmem>>, vector<1x8x128xf32>
          %70 = vector.shape_cast %69 : vector<1x8x128xf32> to vector<8x128xf32>
          %c0_37 = arith.constant 0 : index
          %c0_38 = arith.constant 0 : index
          %71 = vector.load %arg14[%c0_37, %c0_38] : memref<8x128xf32, #tpu.memory_space<vmem>>, vector<8x128xf32>
          tpu.vector_store %arg14[%c0_37, %c0_38], %70 {strides = array<i32>} : memref<8x128xf32, #tpu.memory_space<vmem>>, vector<8x128xf32>,
        } else {
        }
        %c0_i32_33 = arith.constant 0 : i32
        %65 = arith.cmpi eq, %61, %c0_i32_33 : i32
        %66 = arith.extui %65 : i1 to i32
        %c0_i32_34 = arith.constant 0 : i32
        %67 = arith.cmpi ne, %66, %c0_i32_34 : i32
        scf.if %67 {
          %68 = tpu.iota {dimensions = array<i32: 1>} : vector<8x128xi32>
          %cst_35 = arith.constant dense<0xFF800000> : vector<8xf32>
          %69 = vector.multi_reduction <maximumf>, %52, %cst_35 [1] : vector<8x128xf32> to vector<8xf32>
          %70 = vector.shape_cast %69 : vector<8xf32> to vector<8x1xf32>
          %71 = vector.broadcast %70 : vector<8x1xf32> to vector<8x128xf32>
          %72 = arith.cmpf oeq, %52, %71 : vector<8x128xf32>
          %c128_i32 = arith.constant 128 : i32
          %73 = vector.broadcast %c128_i32 : i32 to vector<8x128xi32>
          %74 = arith.select %72, %68, %73 : vector<8x128xi1>, vector<8x128xi32>
          %cst_36 = arith.constant dense<2147483647> : vector<8xi32>
          %75 = vector.multi_reduction <minsi>, %74, %cst_36 [1] : vector<8x128xi32> to vector<8xi32>
          %76 = vector.shape_cast %75 : vector<8xi32> to vector<8x1xi32>
          %77 = vector.broadcast %76 : vector<8x1xi32> to vector<8x128xi32>
          %78 = arith.cmpi eq, %68, %77 : vector<8x128xi32>
          %79 = arith.extui %78 : vector<8x128xi1> to vector<8x128xi32>
          %80 = arith.sitofp %79 : vector<8x128xi32> to vector<8x128xf32>
          %c0_37 = arith.constant 0 : index
          %c0_38 = arith.constant 0 : index
          %81 = vector.load %arg8[%c0_37, %c0_38] : memref<128x128xf32, #tpu.memory_space<vmem>>, vector<128x128xf32>
          %cst_39 = arith.constant dense<0.000000e+00> : vector<8x128xf32>
          %82 = tpu.matmul %80, %81, %cst_39 {dimension_numbers = #tpu.dot_dimension_numbers<[1], [0], [0], [1], [0, 0, 1, 1], [], []>} : vector<8x128xf32>, vector<128x128xf32>, vector<8x128xf32> -> vector<8x128xf32>
          %c0_40 = arith.constant 0 : index
          %c0_41 = arith.constant 0 : index
          %83 = vector.load %arg14[%c0_40, %c0_41] : memref<8x128xf32, #tpu.memory_space<vmem>>, vector<8x128xf32>
          tpu.vector_store %arg14[%c0_40, %c0_41], %82 {strides = array<i32>} : memref<8x128xf32, #tpu.memory_space<vmem>>, vector<8x128xf32>,
        } else {
        }
      } else {
      }
    } else {
    }
    return
  }
  func.func @transform_0(%arg0: i32, %arg1: memref<5xi32, #tpu.memory_space<smem>>) -> (i32, i32, i32) {
    %c0_i32 = arith.constant 0 : i32
    %c0_i32_0 = arith.constant 0 : i32
    %c0_i32_1 = arith.constant 0 : i32
    %c0_i32_2 = arith.constant 0 : i32
    return %c0_i32, %c0_i32_0, %c0_i32_1 : i32, i32, i32
  }
  func.func @transform_1(%arg0: i32, %arg1: memref<5xi32, #tpu.memory_space<smem>>) -> (i32, i32, i32) {
    %c0_i32 = arith.constant 0 : i32
    %c0_i32_0 = arith.constant 0 : i32
    %c0_i32_1 = arith.constant 0 : i32
    %c0_i32_2 = arith.constant 0 : i32
    return %c0_i32, %c0_i32_0, %c0_i32_1 : i32, i32, i32
  }
  func.func @transform_2(%arg0: i32, %arg1: memref<5xi32, #tpu.memory_space<smem>>) -> (i32, i32) {
    %c0_i32 = arith.constant 0 : i32
    %c0_i32_0 = arith.constant 0 : i32
    %c0_i32_1 = arith.constant 0 : i32
    return %c0_i32, %c0_i32_0 : i32, i32
  }
  func.func @transform_3(%arg0: i32, %arg1: memref<5xi32, #tpu.memory_space<smem>>) -> (i32, i32) {
    %c0_i32 = arith.constant 0 : i32
    %c0_i32_0 = arith.constant 0 : i32
    %c0_i32_1 = arith.constant 0 : i32
    return %c0_i32, %c0_i32_0 : i32, i32
  }
  func.func @transform_4(%arg0: i32, %arg1: memref<5xi32, #tpu.memory_space<smem>>) -> (i32, i32) {
    %c0_i32 = arith.constant 0 : i32
    %c0_i32_0 = arith.constant 0 : i32
    %c0_i32_1 = arith.constant 0 : i32
    return %c0_i32, %c0_i32_0 : i32, i32
  }
  func.func @transform_5(%arg0: i32, %arg1: memref<5xi32, #tpu.memory_space<smem>>) -> (i32, i32) {
    %c0_i32 = arith.constant 0 : i32
    %c0_i32_0 = arith.constant 0 : i32
    %c0_i32_1 = arith.constant 0 : i32
    return %c0_i32, %c0_i32_0 : i32, i32
  }
  func.func @transform_6(%arg0: i32, %arg1: memref<5xi32, #tpu.memory_space<smem>>) -> (i32, i32) {
    %c0_i32 = arith.constant 0 : i32
    %c0_i32_0 = arith.constant 0 : i32
    %c0_i32_1 = arith.constant 0 : i32
    return %c0_i32, %c0_i32_0 : i32, i32
  }
  func.func @transform_7(%arg0: i32, %arg1: memref<5xi32, #tpu.memory_space<smem>>) -> (i32, i32) {
    %c0_i32 = arith.constant 0 : i32
    %c0_i32_0 = arith.constant 0 : i32
    %c0_i32_1 = arith.constant 0 : i32
    return %c0_i32, %c0_i32_0 : i32, i32
  }
  func.func @transform_8(%arg0: i32, %arg1: memref<5xi32, #tpu.memory_space<smem>>) -> (i32, i32) {
    %c0_i32 = arith.constant 0 : i32
    %c0_i32_0 = arith.constant 0 : i32
    %c0_i32_1 = arith.constant 0 : i32
    return %c0_i32, %c0_i32_0 : i32, i32
  }
  func.func @transform_9(%arg0: i32, %arg1: memref<5xi32, #tpu.memory_space<smem>>) -> (i32, i32, i32) {
    %c0_i32 = arith.constant 0 : i32
    %c0_i32_0 = arith.constant 0 : i32
    %c0_i32_1 = arith.constant 0 : i32
    return %arg0, %c0_i32, %c0_i32_0 : i32, i32, i32
  }
}

</mosaic_0001>

<bundles_post_ra>
// kernel: seq2seq_forward.1
= control target key start
LH: loop header
LB: loop body
LE: loop exit
PB: predicated region body
PF: predicated region fallthrough
CT: control target
= control target key end

     0   :  { %s1989_s0 = inlined_call_operand.vmem [shape: s32[5], index: 0, kind: input, shape index: {}]   ;;  %s1990_s1 = inlined_call_operand.vmem [shape: f32[6,8,128], index: 1, kind: input, shape index: {}]   ;;  %s1991_s2 = inlined_call_operand.vmem [shape: f32[5,8,128], index: 2, kind: input, shape index: {}]   ;;  %s1992_s3 = inlined_call_operand.vmem [shape: f32[128,512], index: 3, kind: input, shape index: {}]   ;;  %s1993_s4 = inlined_call_operand.vmem [shape: f32[1,512], index: 4, kind: input, shape index: {}]   ;;  %s1994_s5 = inlined_call_operand.vmem [shape: f32[128,512], index: 5, kind: input, shape index: {}]   ;;  %s1995_s6 = inlined_call_operand.vmem [shape: f32[1,512], index: 6, kind: input, shape index: {}]   ;;  %s1996_s7 = inlined_call_operand.vmem [shape: f32[128,128], index: 7, kind: input, shape index: {}]   ;;  %s1997_s8 = inlined_call_operand.hbm [shape: f32[128,128], index: 8, kind: input, shape index: {}]   ;;  %s1998_s9 = inlined_call_operand.vmem [shape: f32[1,128], index: 9, kind: input, shape index: {}]   ;;  %s1999_s10 = inlined_call_operand.vmem [shape: f32[10,8,128], index: 10, kind: output, shape index: {}]  }
   0x1   :  { %s15_s15 = sshll.u32 %s1989_s0, 4  ;;  %s16_s15 = int_to_ptr.vmem [resolvable:$true] %s15_s15 }
   0x2   :  { %s1344_s16 = scalar_lea.vmem %s16_s15, 16  ;;  %p1349_p1 = scmp.lt.s32.totalorder %s16_s15, %s16_s15 }
   0x3   :  { %p1345_p0 = scmp.ne.s32.totalorder %s16_s15, %s1344_s16  ;;  %p1350_p2 = scmp.lt.s32.totalorder %s1344_s16, %s1344_s16 }
   0x5   :  { %p1351_p3 = por %p1350_p2, %p1349_p1 }
   0x7   :  { %p1352_p4 = pnand %p1351_p3, %p1345_p0 }
   0x9   :  { %1355 = shalt.err (!%p1352_p4)  }
   0xa   :  { %s1396_s17 = smov [#allocation6]  }
   0xb   :  { %18 = dma.vmem_to_smem %s16_s15, 16, %s1396_s17, [#allocation5] }
   0xc   :  { %1386 = dma.done.wait [#allocation5], 16 }
   0xd   :  { %1387 = vsyncadd [#allocation5], 4294967280 }
   0xe   :  { %20 = sfence }
   0xf   :  { %21 = vsyncpa [#allocation8], 0  ;;  %s1465_s18 = smov 0  }
  0x10 LB: > { %s1471_s0 = sadd.s32 4294967295, %s1394_s18   ;;  %p1153_p5 = scmp.ge.s32.totalorder %s1394_s18, 1  ;;  %s1394_s18 = sphi %s1465_s18, %s27_s18  }
  0x11   : > { %p247_p6 = scmp.lt.s32.totalorder %s1394_s18, 11  ;;  %s1397_s19 = smov [#allocation7]  }
  0x12   : > { %s280_s20 = sshll.u32 %s1397_s19, 4  ;;  %p1291_p9 = scmp.eq.s32.totalorder %s1471_s0, 0  ;;  %s281_s20 = int_to_ptr.vmem [resolvable:$true] %s280_s20 }
  0x13   : > { %p1476_p8 = pnand %p1153_p5, %p247_p6  ;;  %s1367_s22 = scalar_lea.vmem %s281_s20, 2048 }
  0x14   : > { %p1368_p13 = scmp.ne.s32.totalorder %s281_s20, %s1367_s22  ;;  %p1375_p2 = scmp.lt.s32.totalorder %s281_s20, %s281_s20 }
  0x15   : > { %p1287_p10 = pneg %p1476_p8  ;;  %p1376_p3 = scmp.lt.s32.totalorder %s1367_s22, %s1367_s22 }
  0x17   : > { %p1288_p11 = pnand %p1291_p9, %p1287_p10  ;;  %p1377_p4 = por %p1376_p3, %p1375_p2 }
  0x19   : > { %p1358_p12 = pneg %p1288_p11 }
  0x1b   : > { %p1370_p0 = pnand %p1368_p13, %p1358_p12 }
  0x1d   : > { %p1371_p1 = pneg %p1370_p0 }
  0x1f   : > { %p1378_p7 = pnand %p1377_p4, %p1371_p1 }
  0x21   : > { %1381 = shalt.err (!%p1378_p7)
}
  0x22   : > { %s1398_s23 = smov 128   ;;  %s1399_s24 = smov 8  }
  0x23   : > { %1290 = dma.hbm_to_vmem [thread:$0]  (!%p1288_p11), %s1997_s8, 2048, %s281_s20, [#allocation8], %s1398_s23, %s1398_s23, %s1399_s24  }
  0x24   : > { %299 = sbr.rel (%p1476_p8) target bundleno = 1470 (0x5be), region = 56 }
  0x29   : > { %1389 = dma.done.wait (%p1291_p9), [#allocation8], 2048  }
  0x2a   : > { %1391 = vsyncadd (%p1291_p9), [#allocation8], 4294965248  ;;  %p329_p5 = scmp.lt.s32.totalorder %s1471_s0, 9  ;;  %p2001_p6 = scmp.ne.s32.totalorder %s1471_s0, 0 }
  0x2c   : > { %s330_s27 = scalar_select %p329_p5, %s1471_s0, 9 }
  0x2d   : > { %336 = sbr.rel (%p2001_p6) target bundleno = 52 (0x34), region = 64 }
  0x2e   : > { %s1157_s28 = sshll.u32 %s330_s27, 3 }
  0x2f   : > { %s1499_s11 = scalar_lea.vmem %s1999_s10, %s1157_s28 }
  0x32   : > { %v1400_v0 = vmov 0.0  }
  0x33   : > { %337 = vst [vmem:[#allocation2] sm:$0xff] %v1400_v0  ;;  %338 = vst [vmem:[#allocation3] sm:$0xff] %v1400_v0 }
  0x34 PF: > { %p1159_p7 = scmp.ge.s32.totalorder %s1471_s0, 6 }
  0x35   : > { %s1160_s21 = sshll.u32 (!%p1159_p7), %s1471_s0, 3 }
  0x36   : > { %342 = sbr.rel (%p1159_p7) target bundleno = 342 (0x156), region = 68  ;;  %s345_s17 = scalar_lea.vmem (!%p1159_p7), %s1990_s1, %s1160_s21 }
  0x3b   : > { %v410_v1 = vld [vmem:[%s1992_s3 + $0x1e8] sm:$0xff]  ;;  %v409_v2 = vld [vmem:[%s1992_s3 + $0x1e0] sm:$0xff]  ;;  %v1401_v5 = vmov 0.0   ;;  %v412_v10 = vld [vmem:[%s1992_s3 + $0x1f8] sm:$0xff] }
  0x3c   : > { %v406_v3 = vld [vmem:[%s1992_s3 + $0x1c8] sm:$0xff]  ;;  %435 = vmatprep.subr.mxu0 %v410_v1  ;;  %v405_v4 = vld [vmem:[%s1992_s3 + $0x1c0] sm:$0xff]  ;;  %343 = vst [vmem:[%s1499_s11] sm:$0xff] %v1401_v5  ;;  %499 = vmatprep.mubr.f32.mxu0 %v1401_v5  ;;  %v411_v12 = vld [vmem:[%s1992_s3 + $0x1f0] sm:$0xff] }
  0x3d   : > { %436 = vmatpush1.msra.mxu0 %v409_v2  ;;  %v402_v6 = vld [vmem:[%s1992_s3 + $0x1a8] sm:$0xff]  ;;  %570 = vmatprep.mubr.f32.mxu1 %v1401_v5  ;;  %v401_v7 = vld [vmem:[%s1992_s3 + $0x1a0] sm:$0xff]  ;;  %v408_v14 = vld [vmem:[%s1992_s3 + $0x1d8] sm:$0xff]  ;;  %v415_v5 = vlaneseq }
  0x3e   : > { %437 = vmatprep.subr.mxu0 %v406_v3  ;;  %v398_v8 = vld [vmem:[%s1992_s3 + $0x188] sm:$0xff]  ;;  %v397_v9 = vld [vmem:[%s1992_s3 + $0x180] sm:$0xff]  ;;  %506 = vmatprep.subr.mxu1 %v412_v10  ;;  %v407_v15 = vld [vmem:[%s1992_s3 + $0x1d0] sm:$0xff] }
  0x3f   : > { %438 = vmatpush1.msra.mxu0 %v405_v4  ;;  %v394_v11 = vld [vmem:[%s1992_s3 + $0x168] sm:$0xff]  ;;  %v393_v13 = vld [vmem:[%s1992_s3 + $0x160] sm:$0xff]  ;;  %507 = vmatpush1.msra.mxu1 %v411_v12  ;;  %v404_v17 = vld [vmem:[%s1992_s3 + $0x1b8] sm:$0xff] }
  0x40   : > { %439 = vmatprep.subr.mxu0 %v402_v6  ;;  %v390_v16 = vld [vmem:[%s1992_s3 + $0x148] sm:$0xff]  ;;  %508 = vmatprep.subr.mxu1 %v408_v14  ;;  %v389_v18 = vld [vmem:[%s1992_s3 + $0x140] sm:$0xff]  ;;  %v403_v19 = vld [vmem:[%s1992_s3 + $0x1b0] sm:$0xff]  ;;  %v416_v6 = vshrl.u32 %v415_v5, 7 }
  0x41   : > { %440 = vmatpush1.msra.mxu0 %v401_v7  ;;  %509 = vmatpush1.msra.mxu1 %v407_v15  ;;  %v400_v20 = vld [vmem:[%s1992_s3 + $0x198] sm:$0xff]  ;;  %v386_v21 = vld [vmem:[%s1992_s3 + $0x128] sm:$0xff]  ;;  %v399_v22 = vld [vmem:[%s1992_s3 + $0x190] sm:$0xff] }
  0x42   : > { %441 = vmatprep.subr.mxu0 %v398_v8  ;;  %510 = vmatprep.subr.mxu1 %v404_v17  ;;  %v385_v23 = vld [vmem:[%s1992_s3 + $0x120] sm:$0xff]  ;;  %v396_v24 = vld [vmem:[%s1992_s3 + $0x178] sm:$0xff]  ;;  %v382_v25 = vld [vmem:[%s1992_s3 + $0x108] sm:$0xff]  ;;  %v417_v7 = vsub.s32 0, %v416_v6  ;;  %v429_v17 = vsub.s32 3, %v416_v6 }
  0x43   : > { %442 = vmatpush1.msra.mxu0 %v397_v9  ;;  %511 = vmatpush1.msra.mxu1 %v403_v19  ;;  %v395_v26 = vld [vmem:[%s1992_s3 + $0x170] sm:$0xff]  ;;  %v381_v27 = vld [vmem:[%s1992_s3 + $0x100] sm:$0xff]  ;;  %v392_v28 = vld [vmem:[%s1992_s3 + $0x158] sm:$0xff]  ;;  %v421_v9 = vsub.s32 1, %v416_v6 }
  0x44   : > { %443 = vmatprep.subr.mxu0 %v394_v11  ;;  %512 = vmatprep.subr.mxu1 %v400_v20  ;;  %v378_v29 = vld [vmem:[%s1992_s3 + $0xe8] sm:$0xff]  ;;  %v391_v30 = vld [vmem:[%s1992_s3 + $0x150] sm:$0xff]  ;;  %v377_v31 = vld [vmem:[%s1992_s3 + $0xe0] sm:$0xff]  ;;  %v425_v20 = vsub.s32 2, %v416_v6 }
  0x45   : > { %444 = vmatpush1.msra.mxu0 %v393_v13  ;;  %513 = vmatpush1.msra.mxu1 %v399_v22  ;;  %v388_v32 = vld [vmem:[%s1992_s3 + $0x138] sm:$0xff]  ;;  %v374_v33 = vld [vmem:[%s1992_s3 + $0xc8] sm:$0xff]  ;;  %v387_v34 = vld [vmem:[%s1992_s3 + $0x130] sm:$0xff] }
  0x46   : > { %445 = vmatprep.subr.mxu0 %v390_v16  ;;  %514 = vmatprep.subr.mxu1 %v396_v24  ;;  %v373_v35 = vld [vmem:[%s1992_s3 + $0xc0] sm:$0xff]  ;;  %v384_v36 = vld [vmem:[%s1992_s3 + $0x118] sm:$0xff]  ;;  %v370_v37 = vld [vmem:[%s1992_s3 + $0xa8] sm:$0xff] }
  0x47   : > { %446 = vmatpush1.msra.mxu0 %v389_v18  ;;  %515 = vmatpush1.msra.mxu1 %v395_v26  ;;  %v383_v38 = vld [vmem:[%s1992_s3 + $0x110] sm:$0xff]  ;;  %v369_v39 = vld [vmem:[%s1992_s3 + $0xa0] sm:$0xff]  ;;  %v380_v40 = vld [vmem:[%s1992_s3 + $0xf8] sm:$0xff] }
  0x48   : > { %447 = vmatprep.subr.mxu0 %v386_v21  ;;  %516 = vmatprep.subr.mxu1 %v392_v28  ;;  %v366_v41 = vld [vmem:[%s1992_s3 + $0x88] sm:$0xff]  ;;  %v379_v42 = vld [vmem:[%s1992_s3 + $0xf0] sm:$0xff]  ;;  %v365_v43 = vld [vmem:[%s1992_s3 + $0x80] sm:$0xff] }
  0x49   : > { %448 = vmatpush1.msra.mxu0 %v385_v23  ;;  %517 = vmatpush1.msra.mxu1 %v391_v30  ;;  %v376_v44 = vld [vmem:[%s1992_s3 + $0xd8] sm:$0xff]  ;;  %v362_v45 = vld [vmem:[%s1992_s3 + $0x68] sm:$0xff]  ;;  %v375_v46 = vld [vmem:[%s1992_s3 + $0xd0] sm:$0xff] }
  0x4a   : > { %449 = vmatprep.subr.mxu0 %v382_v25  ;;  %518 = vmatprep.subr.mxu1 %v388_v32  ;;  %v361_v47 = vld [vmem:[%s1992_s3 + $0x60] sm:$0xff]  ;;  %v372_v48 = vld [vmem:[%s1992_s3 + $0xb8] sm:$0xff]  ;;  %v358_v49 = vld [vmem:[%s1992_s3 + $0x48] sm:$0xff] }
  0x4b   : > { %450 = vmatpush1.msra.mxu0 %v381_v27  ;;  %519 = vmatpush1.msra.mxu1 %v387_v34  ;;  %v371_v50 = vld [vmem:[%s1992_s3 + $0xb0] sm:$0xff]  ;;  %v357_v51 = vld [vmem:[%s1992_s3 + $0x40] sm:$0xff]  ;;  %v354_v52 = vld [vmem:[%s1992_s3 + $0x28] sm:$0xff] }
  0x4c   : > { %451 = vmatprep.subr.mxu0 %v378_v29  ;;  %520 = vmatprep.subr.mxu1 %v384_v36  ;;  %v368_v53 = vld [vmem:[%s1992_s3 + $0x98] sm:$0xff]  ;;  %v346_v54 = vld [vmem:[%s345_s17] sm:$0xff]  ;;  %v367_v56 = vld [vmem:[%s1992_s3 + $0x90] sm:$0xff] }
  0x4d   : > { %452 = vmatpush1.msra.mxu0 %v377_v31  ;;  %521 = vmatpush1.msra.mxu1 %v383_v38  ;;  %v347_v55 = vld [vmem:[#allocation2] sm:$0xff]  ;;  %v364_v58 = vld [vmem:[%s1992_s3 + $0x78] sm:$0xff]  ;;  %v350_v59 = vld [vmem:[%s1992_s3 + $0x8] sm:$0xff] }
  0x4e   : > { %453 = vmatprep.subr.mxu0 %v374_v33  ;;  %522 = vmatprep.subr.mxu1 %v380_v40  ;;  %v353_v57 = vld [vmem:[%s1992_s3 + $0x20] sm:$0xff]  ;;  %v363_v60 = vld [vmem:[%s1992_s3 + $0x70] sm:$0xff]  ;;  %v348_v62 = vadd.f32 %v347_v55, %v346_v54  ;;  %v360_v63 = vld [vmem:[%s1992_s3 + $0x58] sm:$0xff] }
  0x4f   : > { %454 = vmatpush1.msra.mxu0 %v373_v35  ;;  %523 = vmatpush1.msra.mxu1 %v379_v42  ;;  %v349_v61 = vld [vmem:[%s1992_s3] sm:$0xff]  ;;  %v359_v0 = vld [vmem:[%s1992_s3 + $0x50] sm:$0xff]  ;;  %v356_v1 = vld [vmem:[%s1992_s3 + $0x38] sm:$0xff] }
  0x50   : > { %455 = vmatprep.subr.mxu0 %v370_v37  ;;  %524 = vmatprep.subr.mxu1 %v376_v44  ;;  %v355_v2 = vld [vmem:[%s1992_s3 + $0x30] sm:$0xff]  ;;  %v352_v3 = vld [vmem:[%s1992_s3 + $0x18] sm:$0xff]  ;;  %v413_v8 = vld [vmem:[%s1993_s4] sm:$0xf] }
  0x51   : > { %456 = vmatpush1.msra.mxu0 %v369_v39  ;;  %525 = vmatpush1.msra.mxu1 %v375_v46  ;;  %v351_v4 = vld [vmem:[%s1992_s3 + $0x10] sm:$0xff]  ;;  %v418_v10 = vrot.slane %v413_v8, %v417_v7  ;;  %v422_v11 = vrot.slane %v413_v8, %v421_v9  ;;  %v430_v21 = vrot.slane %v413_v8, %v429_v17  ;;  %v596_v34 = vld [vmem:[#allocation3] sm:$0xff] }
  0x52   : > { %457 = vmatprep.subr.mxu0 %v366_v41  ;;  %526 = vmatprep.subr.mxu1 %v372_v48  ;;  %v426_v23 = vrot.slane %v413_v8, %v425_v20 }
  0x53   : > { %458 = vmatpush1.msra.mxu0 %v365_v43  ;;  %527 = vmatpush1.msra.mxu1 %v371_v50 }
  0x54   : > { %459 = vmatprep.subr.mxu0 %v362_v45  ;;  %528 = vmatprep.subr.mxu1 %v368_v53 }
  0x55   : > { %460 = vmatpush1.msra.mxu0 %v361_v47  ;;  %529 = vmatpush1.msra.mxu1 %v367_v56 }
  0x56   : > { %461 = vmatprep.subr.mxu0 %v358_v49  ;;  %530 = vmatprep.subr.mxu1 %v364_v58 }
  0x57   : > { %462 = vmatpush1.msra.mxu0 %v357_v51  ;;  %531 = vmatpush1.msra.mxu1 %v363_v60 }
  0x58   : > { %463 = vmatprep.subr.mxu0 %v354_v52  ;;  %532 = vmatprep.subr.mxu1 %v360_v63 }
  0x59   : > { %464 = vmatpush1.msra.mxu0 %v353_v57  ;;  %533 = vmatpush1.msra.mxu1 %v359_v0 }
  0x5a   : > { %465 = vmatprep.subr.mxu0 %v350_v59  ;;  %534 = vmatprep.subr.mxu1 %v356_v1 }
  0x5b   : > { %466 = vmatpush1.msra.mxu0 %v349_v61  ;;  %535 = vmatpush1.msra.mxu1 %v355_v2 }
  0x5c   : > { %500 = vmatmul.mubr.f32.vlgmr.msra.gmra.mxu0 %v348_v62  ;;  %536 = vmatprep.subr.mxu1 %v352_v3 }
  0x5d   : > { %537 = vmatpush1.msra.mxu1 %v351_v4 }
  0x5e   : > { %571 = vmatmul.mubr.f32.vlgmr.msra.gmra.mxu1 %v348_v62 }
 0x11c   : > { %v501_v12 = vpop.f32.mrf.mxu0 }
 0x11d   : > { %v502_v13 = vadd.f32 %v501_v12, %v418_v10 }
 0x11e   : > { %v503_v14 = vpop.f32.mrf.mxu0  ;;  %v572_v19 = vpop.f32.mrf.mxu1 }
 0x11f   : > { %v1161_v15 = vmul.f32 -1.442695, %v502_v13  ;;  %v504_v16 = vadd.f32 %v503_v14, %v422_v11  ;;  %v573_v25 = vadd.f32 %v572_v19, %v426_v23 }
 0x120   : > { %v574_v22 = vpop.f32.mrf.mxu1 }
 0x121   : > { %1312 = vpow2.f32 %v1161_v15  ;;  %v1162_v18 = vmul.f32 -1.442695, %v504_v16  ;;  %v575_v24 = vadd.f32 %v574_v22, %v430_v21 }
 0x123   : > { %1314 = vpow2.f32 %v1162_v18  ;;  %v1163_v26 = vmul.f32 -1.442695, %v575_v24 }
 0x124   : > { %1316 = vtanh.f32 %v573_v25 }
 0x125   : > { %1318 = vpow2.f32 %v1163_v26 }
 0x12e   : > { %v1313_v27 = vpop.eup %1312 }
 0x12f   : > { %v580_v28 = vadd.f32 1.0, %v1313_v27 }
 0x130   : > { %v1315_v29 = vpop.eup %1314 }
 0x131   : > { %1320 = vrcp.f32 %v580_v28  ;;  %v586_v30 = vadd.f32 1.0, %v1315_v29  ;;  %v1317_v31 = vpop.eup %1316 }
 0x132   : > { %v1319_v32 = vpop.eup %1318 }
 0x133   : > { %1322 = vrcp.f32 %v586_v30  ;;  %v593_v36 = vadd.f32 1.0, %v1319_v32 }
 0x135   : > { %1324 = vrcp.f32 %v593_v36 }
 0x13e   : > { %v1321_v33 = vpop.eup %1320 }
 0x13f   : > { %v598_v38 = vmul.f32 %v1321_v33, %v1317_v31 }
 0x140   : > { %v1323_v35 = vpop.eup %1322 }
 0x141   : > { %v597_v37 = vmul.f32 %v1323_v35, %v596_v34 }
 0x142   : > { %v1325_v40 = vpop.eup %1324 }
 0x143   : > { %v599_v39 = vadd.f32 %v598_v38, %v597_v37 }
 0x145   : > { %1326 = vtanh.f32 %v599_v39  ;;  %602 = vst [vmem:[#allocation3] sm:$0xff] %v599_v39 }
 0x152   : > { %v1327_v41 = vpop.eup %1326 }
 0x153   : > { %v601_v42 = vmul.f32 %v1327_v41, %v1325_v40 }
 0x155   : > { %603 = vst [vmem:[#allocation2] sm:$0xff] %v601_v42 }
 0x156 PF: > { %p1164_p8 = scmp.lt.s32.totalorder %s1471_s0, 6 }
 0x157   : > { %p1165_p9 = scmp.ne.s32.totalorder (!%p1164_p8), %s1471_s0, 6 }
 0x158   : > { %607 = sbr.rel (%p1164_p8) target bundleno = 1470 (0x5be), region = 72 }
 0x15d   : > { %611 = sbr.rel (%p1165_p9) target bundleno = 356 (0x164), region = 76 }
 0x162   : > { %v612_v43 = vld [vmem:[%s1991_s2] sm:$0xff] }
 0x163   : > { %613 = vst [vmem:[#allocation4] sm:$0xff] %v612_v43 }
 0x164 PF: > { %v678_v44 = vld [vmem:[%s1994_s5 + $0x1e8] sm:$0xff]  ;;  %v677_v45 = vld [vmem:[%s1994_s5 + $0x1e0] sm:$0xff]  ;;  %v1402_v48 = vmov 0.0   ;;  %v680_v53 = vld [vmem:[%s1994_s5 + $0x1f8] sm:$0xff]  ;;  %vm1403_vm0 = vmmov 0   ;;  %p1170_p10 = scmp.ge.s32.totalorder %s1471_s0, 9 }
 0x165   : > { %v674_v46 = vld [vmem:[%s1994_s5 + $0x1c8] sm:$0xff]  ;;  %703 = vmatprep.subr.mxu0 %v678_v44  ;;  %v673_v47 = vld [vmem:[%s1994_s5 + $0x1c0] sm:$0xff]  ;;  %767 = vmatprep.mubr.f32.mxu0 %v1402_v48  ;;  %v679_v55 = vld [vmem:[%s1994_s5 + $0x1f0] sm:$0xff]  ;;  %s1171_s29 = sadd.s32 (!%p1170_p10), 4294967291, %s1471_s0 }
 0x166   : > { %704 = vmatpush1.msra.mxu0 %v677_v45  ;;  %v670_v49 = vld [vmem:[%s1994_s5 + $0x1a8] sm:$0xff]  ;;  %838 = vmatprep.mubr.f32.mxu1 %v1402_v48  ;;  %v669_v50 = vld [vmem:[%s1994_s5 + $0x1a0] sm:$0xff]  ;;  %v676_v57 = vld [vmem:[%s1994_s5 + $0x1d8] sm:$0xff]  ;;  %s971_s30 = sld [smem:[#allocation6 + %s1171_s29]] (!%p1170_p10) }
 0x167   : > { %705 = vmatprep.subr.mxu0 %v674_v46  ;;  %v666_v51 = vld [vmem:[%s1994_s5 + $0x188] sm:$0xff]  ;;  %v665_v52 = vld [vmem:[%s1994_s5 + $0x180] sm:$0xff]  ;;  %774 = vmatprep.subr.mxu1 %v680_v53  ;;  %v675_v58 = vld [vmem:[%s1994_s5 + $0x1d0] sm:$0xff] }
 0x168   : > { %706 = vmatpush1.msra.mxu0 %v673_v47  ;;  %v662_v54 = vld [vmem:[%s1994_s5 + $0x168] sm:$0xff]  ;;  %v661_v56 = vld [vmem:[%s1994_s5 + $0x160] sm:$0xff]  ;;  %775 = vmatpush1.msra.mxu1 %v679_v55  ;;  %v672_v60 = vld [vmem:[%s1994_s5 + $0x1b8] sm:$0xff] }
 0x169   : > { %707 = vmatprep.subr.mxu0 %v670_v49  ;;  %v658_v59 = vld [vmem:[%s1994_s5 + $0x148] sm:$0xff]  ;;  %776 = vmatprep.subr.mxu1 %v676_v57  ;;  %v657_v61 = vld [vmem:[%s1994_s5 + $0x140] sm:$0xff]  ;;  %v671_v62 = vld [vmem:[%s1994_s5 + $0x1b0] sm:$0xff] }
 0x16a   : > { %708 = vmatpush1.msra.mxu0 %v669_v50  ;;  %777 = vmatpush1.msra.mxu1 %v675_v58  ;;  %v668_v63 = vld [vmem:[%s1994_s5 + $0x198] sm:$0xff]  ;;  %v654_v0 = vld [vmem:[%s1994_s5 + $0x128] sm:$0xff]  ;;  %v667_v1 = vld [vmem:[%s1994_s5 + $0x190] sm:$0xff] }
 0x16b   : > { %709 = vmatprep.subr.mxu0 %v666_v51  ;;  %778 = vmatprep.subr.mxu1 %v672_v60  ;;  %v653_v2 = vld [vmem:[%s1994_s5 + $0x120] sm:$0xff]  ;;  %v664_v3 = vld [vmem:[%s1994_s5 + $0x178] sm:$0xff]  ;;  %v650_v4 = vld [vmem:[%s1994_s5 + $0x108] sm:$0xff] }
 0x16c   : > { %710 = vmatpush1.msra.mxu0 %v665_v52  ;;  %779 = vmatpush1.msra.mxu1 %v671_v62  ;;  %v663_v5 = vld [vmem:[%s1994_s5 + $0x170] sm:$0xff]  ;;  %v649_v6 = vld [vmem:[%s1994_s5 + $0x100] sm:$0xff]  ;;  %v660_v7 = vld [vmem:[%s1994_s5 + $0x158] sm:$0xff]  ;;  %p1172_p11 = scmp.eq.s32.totalorder (!%p1170_p10), %s971_s30, 0 }
 0x16d   : > { %711 = vmatprep.subr.mxu0 %v662_v54  ;;  %780 = vmatprep.subr.mxu1 %v668_v63  ;;  %v646_v8 = vld [vmem:[%s1994_s5 + $0xe8] sm:$0xff]  ;;  %v659_v9 = vld [vmem:[%s1994_s5 + $0x150] sm:$0xff]  ;;  %v645_v10 = vld [vmem:[%s1994_s5 + $0xe0] sm:$0xff] }
 0x16e   : > { %712 = vmatpush1.msra.mxu0 %v661_v56  ;;  %781 = vmatpush1.msra.mxu1 %v667_v1  ;;  %v656_v11 = vld [vmem:[%s1994_s5 + $0x138] sm:$0xff]  ;;  %v642_v12 = vld [vmem:[%s1994_s5 + $0xc8] sm:$0xff]  ;;  %v655_v13 = vld [vmem:[%s1994_s5 + $0x130] sm:$0xff]  ;;  %v683_v1 = vlaneseq }
 0x16f   : > { %713 = vmatprep.subr.mxu0 %v658_v59  ;;  %782 = vmatprep.subr.mxu1 %v664_v3  ;;  %v641_v14 = vld [vmem:[%s1994_s5 + $0xc0] sm:$0xff]  ;;  %v652_v15 = vld [vmem:[%s1994_s5 + $0x118] sm:$0xff]  ;;  %v638_v16 = vld [vmem:[%s1994_s5 + $0xa8] sm:$0xff] }
 0x170   : > { %714 = vmatpush1.msra.mxu0 %v657_v61  ;;  %783 = vmatpush1.msra.mxu1 %v663_v5  ;;  %v651_v17 = vld [vmem:[%s1994_s5 + $0x110] sm:$0xff]  ;;  %v637_v18 = vld [vmem:[%s1994_s5 + $0xa0] sm:$0xff]  ;;  %v648_v19 = vld [vmem:[%s1994_s5 + $0xf8] sm:$0xff] }
 0x171   : > { %715 = vmatprep.subr.mxu0 %v654_v0  ;;  %784 = vmatprep.subr.mxu1 %v660_v7  ;;  %v634_v20 = vld [vmem:[%s1994_s5 + $0x88] sm:$0xff]  ;;  %v647_v21 = vld [vmem:[%s1994_s5 + $0xf0] sm:$0xff]  ;;  %v633_v22 = vld [vmem:[%s1994_s5 + $0x80] sm:$0xff] }
 0x172   : > { %716 = vmatpush1.msra.mxu0 %v653_v2  ;;  %785 = vmatpush1.msra.mxu1 %v659_v9  ;;  %v644_v23 = vld [vmem:[%s1994_s5 + $0xd8] sm:$0xff]  ;;  %v630_v24 = vld [vmem:[%s1994_s5 + $0x68] sm:$0xff]  ;;  %v643_v25 = vld [vmem:[%s1994_s5 + $0xd0] sm:$0xff]  ;;  %v684_v2 = vshrl.u32 %v683_v1, 7 }
 0x173   : > { %717 = vmatprep.subr.mxu0 %v650_v4  ;;  %786 = vmatprep.subr.mxu1 %v656_v11  ;;  %v629_v26 = vld [vmem:[%s1994_s5 + $0x60] sm:$0xff]  ;;  %v640_v27 = vld [vmem:[%s1994_s5 + $0xb8] sm:$0xff]  ;;  %v626_v28 = vld [vmem:[%s1994_s5 + $0x48] sm:$0xff] }
 0x174   : > { %718 = vmatpush1.msra.mxu0 %v649_v6  ;;  %787 = vmatpush1.msra.mxu1 %v655_v13  ;;  %v639_v29 = vld [vmem:[%s1994_s5 + $0xb0] sm:$0xff]  ;;  %v625_v30 = vld [vmem:[%s1994_s5 + $0x40] sm:$0xff]  ;;  %v622_v31 = vld [vmem:[%s1994_s5 + $0x28] sm:$0xff]  ;;  %v685_v3 = vsub.s32 0, %v684_v2  ;;  %v689_v5 = vsub.s32 1, %v684_v2  ;;  %v697_v13 = vsub.s32 3, %v684_v2 }
 0x175   : > { %719 = vmatprep.subr.mxu0 %v646_v8  ;;  %788 = vmatprep.subr.mxu1 %v652_v15  ;;  %v636_v32 = vld [vmem:[%s1994_s5 + $0x98] sm:$0xff]  ;;  %v614_v33 = vld [vmem:[#allocation4] sm:$0xff]  ;;  %v615_v34 = vld [vmem:[#allocation2] sm:$0xff]  ;;  %v693_v15 = vsub.s32 2, %v684_v2 }
 0x176   : > { %720 = vmatpush1.msra.mxu0 %v645_v10  ;;  %789 = vmatpush1.msra.mxu1 %v651_v17  ;;  %v635_v35 = vld [vmem:[%s1994_s5 + $0x90] sm:$0xff]  ;;  %v621_v36 = vld [vmem:[%s1994_s5 + $0x20] sm:$0xff]  ;;  %v632_v37 = vld [vmem:[%s1994_s5 + $0x78] sm:$0xff]  ;;  %v616_v41 = vadd.f32 %v615_v34, %v614_v33 }
 0x177   : > { %721 = vmatprep.subr.mxu0 %v642_v12  ;;  %790 = vmatprep.subr.mxu1 %v648_v19  ;;  %v618_v38 = vld [vmem:[%s1994_s5 + $0x8] sm:$0xff]  ;;  %v631_v39 = vld [vmem:[%s1994_s5 + $0x70] sm:$0xff]  ;;  %v617_v40 = vld [vmem:[%s1994_s5] sm:$0xff] }
 0x178   : > { %722 = vmatpush1.msra.mxu0 %v641_v14  ;;  %791 = vmatpush1.msra.mxu1 %v647_v21  ;;  %v628_v42 = vld [vmem:[%s1994_s5 + $0x58] sm:$0xff]  ;;  %v627_v43 = vld [vmem:[%s1994_s5 + $0x50] sm:$0xff]  ;;  %v886_v50 = vld [vmem:[#allocation7 + $0x70] sm:$0xff] }
 0x179   : > { %723 = vmatprep.subr.mxu0 %v638_v16  ;;  %792 = vmatprep.subr.mxu1 %v644_v23  ;;  %v624_v44 = vld [vmem:[%s1994_s5 + $0x38] sm:$0xff]  ;;  %v623_v45 = vld [vmem:[%s1994_s5 + $0x30] sm:$0xff]  ;;  %v885_v51 = vld [vmem:[#allocation7 + $0x68] sm:$0xff] }
 0x17a   : > { %724 = vmatpush1.msra.mxu0 %v637_v18  ;;  %793 = vmatpush1.msra.mxu1 %v643_v25  ;;  %v620_v46 = vld [vmem:[%s1994_s5 + $0x18] sm:$0xff]  ;;  %v619_v47 = vld [vmem:[%s1994_s5 + $0x10] sm:$0xff]  ;;  %v882_v54 = vld [vmem:[#allocation7 + $0x50] sm:$0xff] }
 0x17b   : > { %725 = vmatprep.subr.mxu0 %v634_v20  ;;  %794 = vmatprep.subr.mxu1 %v640_v27  ;;  %v887_v49 = vld [vmem:[#allocation7 + $0x78] sm:$0xff]  ;;  %v884_v52 = vld [vmem:[#allocation7 + $0x60] sm:$0xff]  ;;  %v881_v55 = vld [vmem:[#allocation7 + $0x48] sm:$0xff] }
 0x17c   : > { %726 = vmatpush1.msra.mxu0 %v633_v22  ;;  %795 = vmatpush1.msra.mxu1 %v639_v29  ;;  %v883_v53 = vld [vmem:[#allocation7 + $0x58] sm:$0xff]  ;;  %v880_v56 = vld [vmem:[#allocation7 + $0x40] sm:$0xff]  ;;  %v878_v58 = vld [vmem:[#allocation7 + $0x30] sm:$0xff] }
 0x17d   : > { %727 = vmatprep.subr.mxu0 %v630_v24  ;;  %796 = vmatprep.subr.mxu1 %v636_v32  ;;  %v879_v57 = vld [vmem:[#allocation7 + $0x38] sm:$0xff]  ;;  %v877_v59 = vld [vmem:[#allocation7 + $0x28] sm:$0xff]  ;;  %v876_v60 = vld [vmem:[#allocation7 + $0x20] sm:$0xff] }
 0x17e   : > { %728 = vmatpush1.msra.mxu0 %v629_v26  ;;  %797 = vmatpush1.msra.mxu1 %v635_v35  ;;  %v875_v61 = vld [vmem:[#allocation7 + $0x18] sm:$0xff]  ;;  %v874_v62 = vld [vmem:[#allocation7 + $0x10] sm:$0xff]  ;;  %v873_v63 = vld [vmem:[#allocation7 + $0x8] sm:$0xff] }
 0x17f   : > { %729 = vmatprep.subr.mxu0 %v626_v28  ;;  %798 = vmatprep.subr.mxu1 %v632_v37  ;;  %v872_v0 = vld [vmem:[#allocation7] sm:$0xff]  ;;  %v681_v4 = vld [vmem:[%s1995_s6] sm:$0xf]  ;;  %v864_v29 = vld [vmem:[#allocation3] sm:$0xff] }
 0x180   : > { %730 = vmatpush1.msra.mxu0 %v625_v30  ;;  %799 = vmatpush1.msra.mxu1 %v631_v39  ;;  %v686_v6 = vrot.slane %v681_v4, %v685_v3  ;;  %v690_v7 = vrot.slane %v681_v4, %v689_v5  ;;  %v698_v16 = vrot.slane %v681_v4, %v697_v13 }
 0x181   : > { %731 = vmatprep.subr.mxu0 %v622_v31  ;;  %800 = vmatprep.subr.mxu1 %v628_v42  ;;  %v694_v18 = vrot.slane %v681_v4, %v693_v15 }
 0x182   : > { %732 = vmatpush1.msra.mxu0 %v621_v36  ;;  %801 = vmatpush1.msra.mxu1 %v627_v43 }
 0x183   : > { %733 = vmatprep.subr.mxu0 %v618_v38  ;;  %802 = vmatprep.subr.mxu1 %v624_v44  ;;  %v1169_v38 = vld [vmem:[%s1998_s9] ss:$0 sm:$0xff] }
 0x184   : > { %734 = vmatpush1.msra.mxu0 %v617_v40  ;;  %803 = vmatpush1.msra.mxu1 %v623_v45 }
 0x185   : > { %768 = vmatmul.mubr.f32.vlgmr.msra.gmra.mxu0 %v616_v41  ;;  %1213 = vmatprep.subr.mxu0 %v1402_v48 }
 0x186   : > { %804 = vmatprep.subr.mxu1 %v620_v46  ;;  %1214 = vmatpush3.msra.mxu0 %v887_v49 }
 0x187   : > { %805 = vmatpush1.msra.mxu1 %v619_v47  ;;  %1215 = vmatprep.subr.mxu0 %v1402_v48 }
 0x188   : > { %839 = vmatmul.mubr.f32.vlgmr.msra.gmra.mxu1 %v616_v41  ;;  %1216 = vmatpush3.msra.mxu0 %v886_v50 }
 0x189   : > { %1217 = vmatprep.subr.mxu0 %v1402_v48  ;;  %1245 = vmatprep.mubr.msk.f32.mxu0 %vm1403_vm0, %v1402_v48 }
 0x18a   : > { %1218 = vmatpush3.msra.mxu0 %v885_v51 }
 0x18b   : > { %1219 = vmatprep.subr.mxu0 %v1402_v48 }
 0x18c   : > { %1220 = vmatpush3.msra.mxu0 %v884_v52 }
 0x18d   : > { %1221 = vmatprep.subr.mxu0 %v1402_v48 }
 0x18e   : > { %1222 = vmatpush3.msra.mxu0 %v883_v53 }
 0x18f   : > { %1223 = vmatprep.subr.mxu0 %v1402_v48 }
 0x190   : > { %1224 = vmatpush3.msra.mxu0 %v882_v54 }
 0x191   : > { %1225 = vmatprep.subr.mxu0 %v1402_v48 }
 0x192   : > { %1226 = vmatpush3.msra.mxu0 %v881_v55 }
 0x193   : > { %1227 = vmatprep.subr.mxu0 %v1402_v48 }
 0x194   : > { %1228 = vmatpush3.msra.mxu0 %v880_v56 }
 0x195   : > { %1229 = vmatprep.subr.mxu0 %v1402_v48 }
 0x196   : > { %1230 = vmatpush3.msra.mxu0 %v879_v57 }
 0x197   : > { %1231 = vmatprep.subr.mxu0 %v1402_v48 }
 0x198   : > { %1232 = vmatpush3.msra.mxu0 %v878_v58 }
 0x199   : > { %1233 = vmatprep.subr.mxu0 %v1402_v48 }
 0x19a   : > { %1234 = vmatpush3.msra.mxu0 %v877_v59 }
 0x19b   : > { %1235 = vmatprep.subr.mxu0 %v1402_v48 }
 0x19c   : > { %1236 = vmatpush3.msra.mxu0 %v876_v60 }
 0x19d   : > { %1237 = vmatprep.subr.mxu0 %v1402_v48 }
 0x19e   : > { %1238 = vmatpush3.msra.mxu0 %v875_v61 }
 0x19f   : > { %1239 = vmatprep.subr.mxu0 %v1402_v48 }
 0x1a0   : > { %1240 = vmatpush3.msra.mxu0 %v874_v62 }
 0x1a1   : > { %1241 = vmatprep.subr.mxu0 %v1402_v48 }
 0x1a2   : > { %1242 = vmatpush3.msra.mxu0 %v873_v63 }
 0x1a3   : > { %1243 = vmatprep.subr.mxu0 %v1402_v48 }
 0x1a4   : > { %1244 = vmatpush3.msra.mxu0 %v872_v0 }
 0x245   : > { %v769_v8 = vpop.f32.mrf.mxu0 }
 0x246   : > { %v770_v9 = vadd.f32 %v769_v8, %v686_v6 }
 0x247   : > { %v771_v10 = vpop.f32.mrf.mxu0 }
 0x248   : > { %v1166_v11 = vmul.f32 -1.442695, %v770_v9  ;;  %v772_v12 = vadd.f32 %v771_v10, %v690_v7  ;;  %v840_v14 = vpop.f32.mrf.mxu1 }
 0x249   : > { %v841_v20 = vadd.f32 %v840_v14, %v694_v18 }
 0x24a   : > { %1328 = vpow2.f32 %v1166_v11  ;;  %v1167_v48 = vmul.f32 -1.442695, %v772_v12  ;;  %v842_v17 = vpop.f32.mrf.mxu1 }
 0x24b   : > { %v843_v19 = vadd.f32 %v842_v17, %v698_v16 }
 0x24c   : > { %1330 = vpow2.f32 %v1167_v48 }
 0x24d   : > { %v1168_v21 = vmul.f32 -1.442695, %v843_v19  ;;  %1332 = vtanh.f32 %v841_v20 }
 0x24f   : > { %1334 = vpow2.f32 %v1168_v21 }
 0x257   : > { %v1329_v22 = vpop.eup %1328 }
 0x258   : > { %v848_v23 = vadd.f32 1.0, %v1329_v22 }
 0x259   : > { %v1331_v24 = vpop.eup %1330 }
 0x25a   : > { %1336 = vrcp.f32 %v848_v23  ;;  %v854_v25 = vadd.f32 1.0, %v1331_v24  ;;  %v1333_v26 = vpop.eup %1332 }
 0x25c   : > { %1338 = vrcp.f32 %v854_v25  ;;  %v1335_v27 = vpop.eup %1334 }
 0x25d   : > { %v861_v31 = vadd.f32 1.0, %v1335_v27 }
 0x25f   : > { %1340 = vrcp.f32 %v861_v31 }
 0x267   : > { %v1337_v28 = vpop.eup %1336 }
 0x268   : > { %v866_v33 = vmul.f32 %v1337_v28, %v1333_v26 }
 0x269   : > { %v1339_v30 = vpop.eup %1338 }
 0x26a   : > { %v865_v32 = vmul.f32 %v1339_v30, %v864_v29 }
 0x26c   : > { %v867_v34 = vadd.f32 %v866_v33, %v865_v32  ;;  %v1341_v35 = vpop.eup %1340 }
 0x26e   : > { %1342 = vtanh.f32 %v867_v34  ;;  %870 = vst [vmem:[#allocation3] sm:$0xff] %v867_v34 }
 0x27b   : > { %v1343_v36 = vpop.eup %1342 }
 0x27c   : > { %v869_v37 = vmul.f32 %v1343_v36, %v1341_v35 }
 0x27e   : > { %871 = vst [vmem:[#allocation2] sm:$0xff] %v869_v37  ;;  %1246 = vmatmul.mubr.f32.vlgmr.msra.gmra.mxu0 %v869_v37 }
 0x33d   : > { %969 = sbr.rel (%p1170_p10) target bundleno = 1470 (0x5be), region = 80 }
 0x33e   : > { %v961_v39 = vpop.f32.mrf.mxu0 }
 0x33f   : > { %v962_v40 = vadd.f32 %v1169_v38, %v961_v39 }
 0x340   : > { %v1247_v41 = vpop.f32.mrf.mxu0 }
 0x341   : > { %965 = vst [vmem:[%s1499_s11] sm:$0xff] %v962_v40 }
 0x342   : > { %975 = sbr.rel (%p1172_p11) target bundleno = 841 (0x349), region = 84  ;;  %s1173_s12 = sshll.u32 (!%p1172_p11), %s1171_s29, 3 }
 0x343   : > { %s977_s15 = scalar_lea.vmem (!%p1172_p11), %s1991_s2, %s1173_s12 }
 0x347   : > { %v978_v42 = vld [vmem:[%s977_s15] sm:$0xff] }
 0x348   : > { %979 = vst [vmem:[#allocation4] sm:$0xff] %v978_v42 }
 0x349 PF: > { %p1174_p12 = scmp.ne.s32.totalorder %s971_s30, 0 }
 0x34b   : > { %983 = sbr.rel (%p1174_p12) target bundleno = 1470 (0x5be), region = 88 }
 0x350   : > { %986 = vmax.xlane.f32.xlu0 %v962_v40  ;;  %v1934_v43 = vand.u32 127, %v683_v1  ;;  %v1022_v49 = vld [vmem:[%s1996_s7 + $0x78] sm:$0xff]  ;;  %v1404_v50 = vmov 0.0   ;;  %v1021_v51 = vld [vmem:[%s1996_s7 + $0x70] sm:$0xff]  ;;  %v1020_v52 = vld [vmem:[%s1996_s7 + $0x68] sm:$0xff]  ;;  %vm1405_vm3 = vmmov 0  }
 0x351   : > { %1248 = vmatprep.subr.mxu0 %v1404_v50  ;;  %v1019_v53 = vld [vmem:[%s1996_s7 + $0x60] sm:$0xff]  ;;  %v1018_v54 = vld [vmem:[%s1996_s7 + $0x58] sm:$0xff]  ;;  %v1017_v55 = vld [vmem:[%s1996_s7 + $0x50] sm:$0xff]  ;;  %1280 = vmatprep.mubr.msk.f32.mxu0 %vm1405_vm3, %v1404_v50  ;;  %v1406_v11 = vmov 1.0  }
 0x352   : > { %1249 = vmatpush3.msra.mxu0 %v1022_v49  ;;  %v1016_v56 = vld [vmem:[%s1996_s7 + $0x48] sm:$0xff]  ;;  %v1015_v57 = vld [vmem:[%s1996_s7 + $0x40] sm:$0xff]  ;;  %v1014_v58 = vld [vmem:[%s1996_s7 + $0x38] sm:$0xff] }
 0x353   : > { %1250 = vmatprep.subr.mxu0 %v1404_v50  ;;  %v1013_v59 = vld [vmem:[%s1996_s7 + $0x30] sm:$0xff]  ;;  %v1012_v60 = vld [vmem:[%s1996_s7 + $0x28] sm:$0xff]  ;;  %v1011_v61 = vld [vmem:[%s1996_s7 + $0x20] sm:$0xff] }
 0x354   : > { %1251 = vmatpush3.msra.mxu0 %v1021_v51  ;;  %v1010_v62 = vld [vmem:[%s1996_s7 + $0x18] sm:$0xff]  ;;  %v1009_v3 = vld [vmem:[%s1996_s7 + $0x10] sm:$0xff]  ;;  %v1008_v4 = vld [vmem:[%s1996_s7 + $0x8] sm:$0xff] }
 0x355   : > { %1252 = vmatprep.subr.mxu0 %v1404_v50  ;;  %v1007_v5 = vld [vmem:[%s1996_s7] sm:$0xff] }
 0x356   : > { %1253 = vmatpush3.msra.mxu0 %v1020_v52 }
 0x357   : > { %1254 = vmatprep.subr.mxu0 %v1404_v50 }
 0x358   : > { %1255 = vmatpush3.msra.mxu0 %v1019_v53 }
 0x359   : > { %1256 = vmatprep.subr.mxu0 %v1404_v50 }
 0x35a   : > { %1257 = vmatpush3.msra.mxu0 %v1018_v54 }
 0x35b   : > { %1258 = vmatprep.subr.mxu0 %v1404_v50 }
 0x35c   : > { %1259 = vmatpush3.msra.mxu0 %v1017_v55 }
 0x35d   : > { %1260 = vmatprep.subr.mxu0 %v1404_v50 }
 0x35e   : > { %1261 = vmatpush3.msra.mxu0 %v1016_v56 }
 0x35f   : > { %1262 = vmatprep.subr.mxu0 %v1404_v50 }
 0x360   : > { %1263 = vmatpush3.msra.mxu0 %v1015_v57 }
 0x361   : > { %1264 = vmatprep.subr.mxu0 %v1404_v50 }
 0x362   : > { %1265 = vmatpush3.msra.mxu0 %v1014_v58 }
 0x363   : > { %1266 = vmatprep.subr.mxu0 %v1404_v50 }
 0x364   : > { %1267 = vmatpush3.msra.mxu0 %v1013_v59 }
 0x365   : > { %1268 = vmatprep.subr.mxu0 %v1404_v50 }
 0x366   : > { %1269 = vmatpush3.msra.mxu0 %v1012_v60 }
 0x367   : > { %1270 = vmatprep.subr.mxu0 %v1404_v50 }
 0x368   : > { %1271 = vmatpush3.msra.mxu0 %v1011_v61 }
 0x369   : > { %1272 = vmatprep.subr.mxu0 %v1404_v50 }
 0x36a   : > { %1273 = vmatpush3.msra.mxu0 %v1010_v62 }
 0x36b   : > { %1274 = vmatprep.subr.mxu0 %v1404_v50 }
 0x36c   : > { %1275 = vmatpush3.msra.mxu0 %v1009_v3 }
 0x36d   : > { %1276 = vmatprep.subr.mxu0 %v1404_v50 }
 0x36e   : > { %1277 = vmatpush3.msra.mxu0 %v1008_v4 }
 0x36f   : > { %1278 = vmatprep.subr.mxu0 %v1404_v50 }
 0x370   : > { %1279 = vmatpush3.msra.mxu0 %v1007_v5 }
 0x3d9   : > { %v987_v44 = vpop.xlane.xlu0 %986 }
 0x3da   : > { %vm988_vm1 = vcmp.eq.f32.partialorder %v962_v40, %v987_v44 }
 0x3db   : > { %v989_v45 = vsel %vm988_vm1, %v1934_v43, 128 }
 0x3dc   : > { %v991_v46 = vshra.s32 %v989_v45, 16  ;;  %v990_v63 = vand.u32 65535, %v989_v45 }
 0x3de   : > { %v993_v47 = vcvt.s32.f32 %v991_v46  ;;  %v992_v1 = vcvt.s32.f32 %v990_v63 }
 0x3e0   : > { %994 = vmin.xlane.f32.xlu0 %v993_v47 }
 0x469   : > { %v995_v0 = vpop.xlane.xlu0 %994 }
 0x46a   : > { %vm996_vm2 = vcmp.eq.f32.partialorder %v993_v47, %v995_v0  ;;  %v1001_v6 = vcvt.f32.s32 %v995_v0 }
 0x46b   : > { %v997_v2 = vsel %vm996_vm2, %v992_v1, inf }
 0x46c   : > { %998 = vmin.xlane.f32.xlu1 %v997_v2  ;;  %v1002_v8 = vshll.u32 %v1001_v6, 16 }
 0x4f5   : > { %v999_v7 = vpop.xlane.xlu1 %998 }
 0x4f6   : > { %v1000_v9 = vcvt.f32.s32 %v999_v7 }
 0x4f8   : > { %v1003_v10 = vadd.s32 %v1002_v8, %v1000_v9 }
 0x4fa   : > { %vm1004_vm4 = vcmp.eq.s32.totalorder %v1934_v43, %v1003_v10 }
 0x4fb   : > { %1281 = vmatmul.mubr.msk.f32.vlgmr.msra.gmra.mxu0 %vm1004_vm4, %v1406_v11 }
 0x5bb   : > { %v1089_v12 = vpop.f32.mrf.mxu0 }
 0x5bc   : > { %1093 = vst [vmem:[#allocation4] sm:$0xff] %v1089_v12 }
 0x5bd   : > { %v1282_v13 = vpop.f32.mrf.mxu0 }
 0x5be PF: > { %s27_s18 = sadd.s32 1, %s1394_s18  }
 0x5bf   : > { %p24_p13 = scmp.ge.s32.totalorder %s27_s18, 12  }
 0x5c1   :  { %26 = sbr.rel (!%p24_p13) target bundleno = 16 (0x10), region = 118 }
 0x5c6   :  { %1113 = vsyncpa [#allocation8], 1 }
 0x5c7   :  { %1115 = vsyncpa [#allocation8 + $0x1], 1 }

</bundles_post_ra>
